<compile_context>
chip_gen: v7x
topology: tpu7x:2x2x1
jax: 0.10.0
libtpu: 0.0.40
codegen_flags: <defaults>
</compile_context>

<pallas_src>
import jax
import jax.numpy as jnp
from jax.experimental import pallas as pl
from jax.experimental.pallas import tpu as pltpu

_LANE = 128


def _round_up(a: int, b: int) -> int:
    return (a + b - 1) // b * b


def _mlp_kernel(x_ref, w1_ref, b1_ref, w2_ref, b2_ref, o_ref, acc_ref):
    # x_ref: (tm, Din_p) f32      w1_ref: (Din_p, th) bf16   b1_ref: (1, th) f32
    # w2_ref: (th, Dout_p) bf16   b2_ref: (1, Dout_p) f32    o_ref: (tm, Dout_p) f32
    # acc_ref: (tm, Dout_p) f32 scratch accumulator across the (optional) H axis.
    hi = pl.program_id(1)

    @pl.when(hi == 0)
    def _init():
        acc_ref[...] = jnp.zeros_like(acc_ref)

    # Cast activations to bf16 on-chip (one cheap VPU op) instead of in the wrapper.
    x_bf = x_ref[...].astype(jnp.bfloat16)
    h = jnp.dot(x_bf, w1_ref[...], preferred_element_type=jnp.float32)
    h = h + b1_ref[...]
    # tanh-approximate GELU: runs on the EUP (separate VLIW slot) instead of a
    # ~20-op VALU erf polynomial; ~1e-3 deviation from torch's exact GELU.
    h = jax.nn.gelu(h, approximate=True)
    # dropout p=0.0 -> identity (elided)
    acc_ref[...] += jnp.dot(h.astype(jnp.bfloat16), w2_ref[...],
                            preferred_element_type=jnp.float32)

    @pl.when(hi == pl.num_programs(1) - 1)
    def _finish():
        o_ref[...] = (acc_ref[...] + b2_ref[...]).astype(o_ref.dtype)


def _vmem_limit_bytes() -> int:
    """~75% of physical VMEM for this generation (48 MiB conservative fallback)."""
    try:
        phys = int(pltpu.get_tpu_info().vmem_capacity_bytes)
    except Exception:
        phys = 64 * 1024 * 1024  # v7x per-TC size -> safe everywhere
    return (phys * 3) // 4


def _choose_tiles(M, D_in_p, H, D_out_p, budget, tm_pref):
    """Pick (tm, th): resident-weight path first, H-streaming path if weights are huge."""
    H_128 = _round_up(H, _LANE)
    m16 = _round_up(max(M, 1), 16)

    def cost(tm, th, resident):
        if resident:
            wts = (D_in_p * th + th * D_out_p) * 2 + th * 4          # single-buffered
        else:
            wts = 2 * ((D_in_p * th + th * D_out_p) * 2 + th * 4)    # streamed, double-buffered
        wts += D_out_p * 4                                           # b2 (resident)
        io = 2 * tm * (D_in_p + D_out_p) * 4                         # x / out, double-buffered
        scr = tm * D_out_p * 4                                       # f32 accumulator scratch
        mid = tm * th * 6                                            # f32 h + bf16 copy
        return wts + io + scr + mid

    def halvings(start, quantum, floor):
        vals, t = [], max(start, floor)
        while t > floor:
            vals.append(t)
            t = _round_up(max(t // 2, floor), quantum)
        vals.append(floor)
        return list(dict.fromkeys(vals))

    tm_cands = halvings(min(_round_up(tm_pref, 16), m16), 16, 16)

    # Resident-weight path (single H step, W1/W2 stay in VMEM, single-buffered).
    for tm_c in tm_cands:
        if cost(tm_c, H_128, True) <= budget:
            return tm_c, H_128
    # H-streaming path for very large hidden sizes (e.g. v7x's 64 MiB VMEM).
    for th_c in halvings(H_128, _LANE, _LANE):
        for tm_c in tm_cands:
            if cost(tm_c, th_c, False) <= budget:
                return tm_c, th_c
    return 16, _LANE  # last resort; compiler may spill


def mlp_pallas(x, w1, b1, w2, b2, *, tm=512):
    """x: (B, N, D_in) f32, w1: (D_in, H), b1: (H,), w2: (H, D_out), b2: (D_out,).

    Returns (B, N, D_out) in x.dtype.  bf16 MXU inputs vs. an f32 reference
    give ~1e-2 error; callers expecting f32 parity should note this.
    """
    B, N, D_in = x.shape
    H = w1.shape[1]
    D_out = w2.shape[1]
    M = B * N

    D_in_p = _round_up(D_in, _LANE)
    D_out_p = _round_up(D_out, _LANE)

    vmem_limit = _vmem_limit_bytes()
    tile_budget = (vmem_limit * 4) // 5  # headroom for compiler-internal scratch
    tm, th = _choose_tiles(M, D_in_p, H, D_out_p, tile_budget, tm)
    H_p = _round_up(H, th)
    num_h = H_p // th

    # Give v7x's two TensorCores at least two row tiles to split when possible
    # (harmless on 1-TC parts: one extra ~0.35us grid step).
    m16 = _round_up(M, 16)
    if _round_up(M, tm) // tm < 2 and m16 >= 32:
        tm = _round_up((m16 + 1) // 2, 16)
    M_p = _round_up(M, tm)
    num_m = M_p // tm

    # Lane-dense zero padding; x stays f32 (kernel casts to bf16 on-chip).
    x2d = jnp.pad(x.reshape(M, D_in).astype(jnp.float32),
                  ((0, M_p - M), (0, D_in_p - D_in)))
    w1_p = jnp.pad(w1, ((0, D_in_p - D_in), (0, H_p - H))).astype(jnp.bfloat16)
    w2_p = jnp.pad(w2, ((0, H_p - H), (0, D_out_p - D_out))).astype(jnp.bfloat16)
    b1_p = jnp.pad(b1, (0, H_p - H)).reshape(1, H_p).astype(jnp.float32)
    b2_p = jnp.pad(b2, (0, D_out_p - D_out)).reshape(1, D_out_p).astype(jnp.float32)

    resident = num_h == 1

    def spec(shape, index_map, single_buffer=False):
        if single_buffer:
            # Constant index_map -> double-buffering only re-allocates; halve VMEM.
            return pl.BlockSpec(shape, index_map, pipeline_mode=pl.Buffered(1))
        return pl.BlockSpec(shape, index_map)

    cost = pl.CostEstimate(
        flops=2 * M_p * (D_in_p * H_p + H_p * D_out_p),
        transcendentals=M_p * H_p,
        bytes_accessed=(M_p * D_in_p * 4 + M_p * D_out_p * 4
                        + (D_in_p * H_p + H_p * D_out_p) * 2
                        + (H_p + D_out_p) * 4),
    )

    out = pl.pallas_call(
        _mlp_kernel,
        out_shape=jax.ShapeDtypeStruct((M_p, D_out_p), jnp.float32),
        grid_spec=pltpu.PrefetchScalarGridSpec(
            num_scalar_prefetch=0,
            grid=(num_m, num_h),
            in_specs=[
                spec((tm, D_in_p), lambda i, h: (i, 0)),                           # x row tile
                spec((D_in_p, th), lambda i, h: (0, h), single_buffer=resident),   # W1
                spec((1, th), lambda i, h: (0, h), single_buffer=resident),        # b1
                spec((th, D_out_p), lambda i, h: (h, 0), single_buffer=resident),  # W2
                spec((1, D_out_p), lambda i, h: (0, 0), single_buffer=True),       # b2
            ],
            out_specs=pl.BlockSpec((tm, D_out_p), lambda i, h: (i, 0)),
            scratch_shapes=[pltpu.VMEM((tm, D_out_p), jnp.float32)],
        ),
        compiler_params=pltpu.CompilerParams(
            dimension_semantics=("parallel", "arbitrary"),
            vmem_limit_bytes=vmem_limit,
        ),
        cost_estimate=cost,
    )(x2d, w1_p, b1_p, w2_p, b2_p)

    return out[:M, :D_out].reshape(B, N, D_out).astype(x.dtype)


def mlp_reference(x, w1, b1, w2, b2):
    h = x @ w1 + b1
    h = jax.nn.gelu(h, approximate=False)
    return h @ w2 + b2


if __name__ == "__main__":
    # Small shapes consistent with the module: batch=2, seq=8,
    # in_features=32, hidden_features=64, out_features=32.
    B, N, D_in, H, D_out = 2, 8, 32, 64, 32

    key = jax.random.PRNGKey(0)
    kx, k1, k2, k3, k4 = jax.random.split(key, 5)

    x = jax.random.normal(kx, (B, N, D_in), dtype=jnp.float32)
    # deterministic synthetic parameters (nn.Linear-like scale)
    w1 = jax.random.uniform(k1, (D_in, H), minval=-1.0, maxval=1.0) / jnp.sqrt(D_in)
    b1 = jax.random.uniform(k2, (H,), minval=-1.0, maxval=1.0) / jnp.sqrt(D_in)
    w2 = jax.random.uniform(k3, (H, D_out), minval=-1.0, maxval=1.0) / jnp.sqrt(H)
    b2 = jax.random.uniform(k4, (D_out,), minval=-1.0, maxval=1.0) / jnp.sqrt(H)
    w1, b1, w2, b2 = (a.astype(jnp.float32) for a in (w1, b1, w2, b2))

    out = mlp_pallas(x, w1, b1, w2, b2)
    out = jax.block_until_ready(out)

    ref = mlp_reference(x, w1, b1, w2, b2)
    assert out.shape == (B, N, D_out)
    # bf16 MXU inputs + tanh-approx GELU vs. f32/exact reference -> relaxed tolerance.
    assert jnp.allclose(out, ref, atol=5e-2, rtol=5e-2), (
        f"max abs err {jnp.max(jnp.abs(out - ref))}"
    )
    print("KERNEL_OK")
</pallas_src>

<mosaic_0001>
module attributes {stable_mosaic.version = 11 : i64} {
  func.func @_mlp_kernel(%arg0: i32, %arg1: i32, %arg2: memref<16x128xf32, #tpu.memory_space<vmem>>, %arg3: memref<128x128xbf16, #tpu.memory_space<vmem>>, %arg4: memref<1x128xf32, #tpu.memory_space<vmem>>, %arg5: memref<128x128xbf16, #tpu.memory_space<vmem>>, %arg6: memref<1x128xf32, #tpu.memory_space<vmem>>, %arg7: memref<16x128xf32, #tpu.memory_space<vmem>>, %arg8: memref<16x128xf32, #tpu.memory_space<vmem>>) attributes {dimension_semantics = [#tpu.dimension_semantics<parallel>, #tpu.dimension_semantics<arbitrary>], iteration_bounds = array<i64: 1, 1>, scalar_prefetch = 0 : i64, scratch_operands = 1 : i64, tpu.core_type = #tpu.core_type<tc>, window_params = [{transform_indices = @transform_0, window_bounds = array<i64: 16, 128>}, {pipeline_mode = #tpu.pipeline_mode<synchronous>, transform_indices = @transform_1, window_bounds = array<i64: 128, 128>}, {pipeline_mode = #tpu.pipeline_mode<synchronous>, transform_indices = @transform_2, window_bounds = array<i64: 1, 128>}, {pipeline_mode = #tpu.pipeline_mode<synchronous>, transform_indices = @transform_3, window_bounds = array<i64: 128, 128>}, {pipeline_mode = #tpu.pipeline_mode<synchronous>, transform_indices = @transform_4, window_bounds = array<i64: 1, 128>}, {transform_indices = @transform_5, window_bounds = array<i64: 16, 128>}]} {
    %c0_i32 = arith.constant 0 : i32
    %0 = arith.cmpi eq, %arg1, %c0_i32 : i32
    %1 = arith.extui %0 : i1 to i32
    %c0_i32_0 = arith.constant 0 : i32
    %2 = arith.cmpi ne, %1, %c0_i32_0 : i32
    scf.if %2 {
      %cst_19 = arith.constant 0.000000e+00 : f32
      %32 = vector.broadcast %cst_19 : f32 to vector<16x128xf32>
      %c0_20 = arith.constant 0 : index
      %c0_21 = arith.constant 0 : index
      %33 = vector.load %arg8[%c0_20, %c0_21] : memref<16x128xf32, #tpu.memory_space<vmem>>, vector<16x128xf32>
      tpu.vector_store %arg8[%c0_20, %c0_21], %32 {strides = array<i32>} : memref<16x128xf32, #tpu.memory_space<vmem>>, vector<16x128xf32>,
    } else {
    }
    %c0 = arith.constant 0 : index
    %c0_1 = arith.constant 0 : index
    %3 = vector.load %arg2[%c0, %c0_1] : memref<16x128xf32, #tpu.memory_space<vmem>>, vector<16x128xf32>
    %4 = arith.truncf %3 : vector<16x128xf32> to vector<16x128xbf16>
    %c0_2 = arith.constant 0 : index
    %c0_3 = arith.constant 0 : index
    %5 = vector.load %arg3[%c0_2, %c0_3] : memref<128x128xbf16, #tpu.memory_space<vmem>>, vector<128x128xbf16>
    %cst = arith.constant dense<0.000000e+00> : vector<16x128xf32>
    %6 = tpu.matmul %4, %5, %cst {dimension_numbers = #tpu.dot_dimension_numbers<[1], [0], [0], [1], [0, 0, 1, 1], [], []>} : vector<16x128xbf16>, vector<128x128xbf16>, vector<16x128xf32> -> vector<16x128xf32>
    %c0_4 = arith.constant 0 : index
    %c0_5 = arith.constant 0 : index
    %7 = vector.load %arg4[%c0_4, %c0_5] : memref<1x128xf32, #tpu.memory_space<vmem>>, vector<1x128xf32>
    %8 = vector.broadcast %7 : vector<1x128xf32> to vector<16x128xf32>
    %9 = arith.addf %6, %8 : vector<16x128xf32>
    %10 = arith.mulf %9, %9 : vector<16x128xf32>
    %11 = arith.mulf %9, %10 : vector<16x128xf32>
    %cst_6 = arith.constant 4.471500e-02 : f32
    %12 = vector.broadcast %cst_6 : f32 to vector<16x128xf32>
    %13 = arith.mulf %12, %11 : vector<16x128xf32>
    %14 = arith.addf %9, %13 : vector<16x128xf32>
    %cst_7 = arith.constant 0.797884583 : f32
    %15 = vector.broadcast %cst_7 : f32 to vector<16x128xf32>
    %16 = arith.mulf %15, %14 : vector<16x128xf32>
    %17 = math.tanh %16 : vector<16x128xf32>
    %cst_8 = arith.constant 1.000000e+00 : f32
    %18 = vector.broadcast %cst_8 : f32 to vector<16x128xf32>
    %19 = arith.addf %18, %17 : vector<16x128xf32>
    %cst_9 = arith.constant 5.000000e-01 : f32
    %20 = vector.broadcast %cst_9 : f32 to vector<16x128xf32>
    %21 = arith.mulf %20, %19 : vector<16x128xf32>
    %22 = arith.mulf %9, %21 : vector<16x128xf32>
    %c0_10 = arith.constant 0 : index
    %c0_11 = arith.constant 0 : index
    %23 = vector.load %arg8[%c0_10, %c0_11] : memref<16x128xf32, #tpu.memory_space<vmem>>, vector<16x128xf32>
    %24 = arith.truncf %22 : vector<16x128xf32> to vector<16x128xbf16>
    %c0_12 = arith.constant 0 : index
    %c0_13 = arith.constant 0 : index
    %25 = vector.load %arg5[%c0_12, %c0_13] : memref<128x128xbf16, #tpu.memory_space<vmem>>, vector<128x128xbf16>
    %cst_14 = arith.constant dense<0.000000e+00> : vector<16x128xf32>
    %26 = tpu.matmul %24, %25, %cst_14 {dimension_numbers = #tpu.dot_dimension_numbers<[1], [0], [0], [1], [0, 0, 1, 1], [], []>} : vector<16x128xbf16>, vector<128x128xbf16>, vector<16x128xf32> -> vector<16x128xf32>
    %27 = arith.addf %23, %26 : vector<16x128xf32>
    %c0_15 = arith.constant 0 : index
    %c0_16 = arith.constant 0 : index
    %28 = vector.load %arg8[%c0_15, %c0_16] : memref<16x128xf32, #tpu.memory_space<vmem>>, vector<16x128xf32>
    tpu.vector_store %arg8[%c0_15, %c0_16], %27 {strides = array<i32>} : memref<16x128xf32, #tpu.memory_space<vmem>>, vector<16x128xf32>,
    %c0_i32_17 = arith.constant 0 : i32
    %29 = arith.cmpi eq, %arg1, %c0_i32_17 : i32
    %30 = arith.extui %29 : i1 to i32
    %c0_i32_18 = arith.constant 0 : i32
    %31 = arith.cmpi ne, %30, %c0_i32_18 : i32
    scf.if %31 {
      %c0_19 = arith.constant 0 : index
      %c0_20 = arith.constant 0 : index
      %32 = vector.load %arg8[%c0_19, %c0_20] : memref<16x128xf32, #tpu.memory_space<vmem>>, vector<16x128xf32>
      %c0_21 = arith.constant 0 : index
      %c0_22 = arith.constant 0 : index
      %33 = vector.load %arg6[%c0_21, %c0_22] : memref<1x128xf32, #tpu.memory_space<vmem>>, vector<1x128xf32>
      %34 = vector.broadcast %33 : vector<1x128xf32> to vector<16x128xf32>
      %35 = arith.addf %32, %34 : vector<16x128xf32>
      %c0_23 = arith.constant 0 : index
      %c0_24 = arith.constant 0 : index
      %36 = vector.load %arg7[%c0_23, %c0_24] : memref<16x128xf32, #tpu.memory_space<vmem>>, vector<16x128xf32>
      tpu.vector_store %arg7[%c0_23, %c0_24], %35 {strides = array<i32>} : memref<16x128xf32, #tpu.memory_space<vmem>>, vector<16x128xf32>,
    } else {
    }
    return
  }
  func.func @transform_0(%arg0: i32, %arg1: i32) -> (i32, i32) {
    %c0_i32 = arith.constant 0 : i32
    %c0_i32_0 = arith.constant 0 : i32
    return %arg0, %c0_i32 : i32, i32
  }
  func.func @transform_1(%arg0: i32, %arg1: i32) -> (i32, i32) {
    %c0_i32 = arith.constant 0 : i32
    %c0_i32_0 = arith.constant 0 : i32
    return %c0_i32, %arg1 : i32, i32
  }
  func.func @transform_2(%arg0: i32, %arg1: i32) -> (i32, i32) {
    %c0_i32 = arith.constant 0 : i32
    %c0_i32_0 = arith.constant 0 : i32
    return %c0_i32, %arg1 : i32, i32
  }
  func.func @transform_3(%arg0: i32, %arg1: i32) -> (i32, i32) {
    %c0_i32 = arith.constant 0 : i32
    %c0_i32_0 = arith.constant 0 : i32
    return %arg1, %c0_i32 : i32, i32
  }
  func.func @transform_4(%arg0: i32, %arg1: i32) -> (i32, i32) {
    %c0_i32 = arith.constant 0 : i32
    %c0_i32_0 = arith.constant 0 : i32
    %c0_i32_1 = arith.constant 0 : i32
    return %c0_i32, %c0_i32_0 : i32, i32
  }
  func.func @transform_5(%arg0: i32, %arg1: i32) -> (i32, i32) {
    %c0_i32 = arith.constant 0 : i32
    %c0_i32_0 = arith.constant 0 : i32
    return %arg0, %c0_i32 : i32, i32
  }
}

</mosaic_0001>

<bundles_post_ra>
// kernel: tpu_custom_call.1
= control target key start
LH: loop header
LB: loop body
LE: loop exit
PB: predicated region body
PF: predicated region fallthrough
CT: control target
= control target key end

     0   :  { %10 = vsyncpa [#allocation4], 0  ;;  %s654_s0 = inlined_call_operand.hbm [shape: f32[16,128], index: 0, kind: input, shape index: {}]   ;;  %s655_s1 = inlined_call_operand.hbm [shape: bf16[128,128], index: 1, kind: input, shape index: {}]   ;;  %s656_s2 = inlined_call_operand.vmem [shape: f32[1,128], index: 2, kind: input, shape index: {}]   ;;  %s657_s3 = inlined_call_operand.hbm [shape: bf16[128,128], index: 3, kind: input, shape index: {}]   ;;  %s658_s4 = inlined_call_operand.vmem [shape: f32[1,128], index: 4, kind: input, shape index: {}]   ;;  %s659_s5 = inlined_call_operand.hbm [shape: f32[16,128], index: 5, kind: output, shape index: {}]  }
   0x1   :  { %11 = vsyncpa [#allocation7], 0 }
   0x2   :  { %12 = vsyncpa [#allocation5], 0  ;;  %s548_s18 = smov [#allocation6]   ;;  %s454_s22 = scalar_lea.hbm %s655_s1, 1024 }
   0x3   :  { %s30_s19 = sshll.u32 %s548_s18, 4  ;;  %p455_p0 = scmp.ne.s32.totalorder %s655_s1, %s454_s22  ;;  %s31_s19 = int_to_ptr.vmem [resolvable:$true] %s30_s19 }
   0x4   :  { %p458_p1 = scmp.lt.u32.totalorder %s454_s22, %s655_s1 }
   0x6   :  { %p460_p2 = pnand %p458_p1, %p455_p0 }
   0x8   :  { %463 = shalt.err (!%p460_p2)
}
   0x9   :  { %s464_s27 = scalar_lea.vmem %s31_s19, 1024  ;;  %p469_p4 = scmp.lt.s32.totalorder %s31_s19, %s31_s19 }
   0xa   :  { %p465_p3 = scmp.ne.s32.totalorder %s31_s19, %s464_s27  ;;  %p470_p5 = scmp.lt.s32.totalorder %s464_s27, %s464_s27 }
   0xc   :  { %p471_p6 = por %p470_p5, %p469_p4 }
   0xe   :  { %p472_p7 = pnand %p471_p6, %p465_p3 }
  0x10   :  { %475 = shalt.err (!%p472_p7)
}
  0x11   :  { %s549_s28 = smov 64   ;;  %s550_s29 = smov 4  }
  0x12   :  { %36 = dma.hbm_to_vmem [thread:$0]  %s655_s1, 1024, %s31_s19, [#allocation7], %s549_s28, %s549_s28, %s550_s29  }
  0x13   :  { %s551_s7 = smov [#allocation3]   ;;  %s476_s11 = scalar_lea.hbm %s654_s0, 256 }
  0x14   :  { %s18_s8 = sshll.u32 %s551_s7, 4  ;;  %p477_p8 = scmp.ne.s32.totalorder %s654_s0, %s476_s11  ;;  %s19_s8 = int_to_ptr.vmem [resolvable:$true] %s18_s8 }
  0x15   :  { %p480_p9 = scmp.lt.u32.totalorder %s476_s11, %s654_s0 }
  0x17   :  { %p482_p10 = pnand %p480_p9, %p477_p8 }
  0x19   :  { %485 = shalt.err (!%p482_p10)
}
  0x1a   :  { %s486_s16 = scalar_lea.vmem %s19_s8, 256  ;;  %p491_p12 = scmp.lt.s32.totalorder %s19_s8, %s19_s8 }
  0x1b   :  { %p487_p11 = scmp.ne.s32.totalorder %s19_s8, %s486_s16  ;;  %p492_p13 = scmp.lt.s32.totalorder %s486_s16, %s486_s16 }
  0x1d   :  { %p493_p0 = por %p492_p13, %p491_p12 }
  0x1f   :  { %p494_p1 = pnand %p493_p0, %p487_p11 }
  0x21   :  { %497 = shalt.err (!%p494_p1)
}
  0x22   :  { %s552_s1 = smov 128   ;;  %s553_s17 = smov 8  }
  0x23   :  { %24 = dma.hbm_to_vmem [thread:$0]  %s654_s0, 256, %s19_s8, [#allocation4], %s552_s1, %s552_s1, %s553_s17  }
  0x24   :  { %s554_s20 = smov [#allocation8]   ;;  %s498_s24 = scalar_lea.hbm %s657_s3, 1024 }
  0x25   :  { %s44_s21 = sshll.u32 %s554_s20, 4  ;;  %p499_p2 = scmp.ne.s32.totalorder %s657_s3, %s498_s24  ;;  %s45_s21 = int_to_ptr.vmem [resolvable:$true] %s44_s21 }
  0x26   :  { %p502_p3 = scmp.lt.u32.totalorder %s498_s24, %s657_s3 }
  0x28   :  { %p504_p4 = pnand %p502_p3, %p499_p2 }
  0x2a   :  { %507 = shalt.err (!%p504_p4)
}
  0x2b   :  { %s508_s6 = scalar_lea.vmem %s45_s21, 1024  ;;  %p513_p6 = scmp.lt.s32.totalorder %s45_s21, %s45_s21 }
  0x2c   :  { %p509_p5 = scmp.ne.s32.totalorder %s45_s21, %s508_s6  ;;  %p514_p7 = scmp.lt.s32.totalorder %s508_s6, %s508_s6 }
  0x2e   :  { %p515_p8 = por %p514_p7, %p513_p6 }
  0x30   :  { %p516_p9 = pnand %p515_p8, %p509_p5 }
  0x32   :  { %519 = shalt.err (!%p516_p9)
}
  0x33   :  { %50 = dma.hbm_to_vmem [thread:$0]  %s657_s3, 1024, %s45_s21, [#allocation7], %s549_s28, %s549_s28, %s550_s29  }
  0x34   :  { %542 = dma.done.wait [#allocation4], 256  }
  0x35   :  { %543 = vsyncadd [#allocation4], 4294967040 }
  0x36   :  { %544 = dma.done.wait [#allocation7], 2048  }
  0x37   :  { %545 = vsyncadd [#allocation7], 4294965248  ;;  %v555_v0 = vmov 0.0   ;;  %vm556_vm0 = vmmov 0   ;;  %v434_v1 = vld [vmem:[#allocation6] sm:$0xff]   ;;  %v435_v2 = vld [vmem:[#allocation6 + $0x8] sm:$0xff]  }
  0x38   :  { %384 = vmatprep.subr.bf16.mxu0 %v555_v0  ;;  %400 = vmatprep.mubr.msk.bf16.mxu0 %vm556_vm0, %v555_v0  ;;  %v436_v3 = vld [vmem:[#allocation6 + $0x10] sm:$0xff]   ;;  %v437_v4 = vld [vmem:[#allocation6 + $0x18] sm:$0xff]   ;;  %v438_v5 = vld [vmem:[#allocation6 + $0x20] sm:$0xff]   ;;  %s557_s8 = smov [#allocation9]  }
  0x39   :  { %404 = vmatprep.subr.bf16.mxu1 %v555_v0  ;;  %420 = vmatprep.mubr.msk.bf16.mxu1 %vm556_vm0, %v555_v0  ;;  %v439_v6 = vld [vmem:[#allocation6 + $0x28] sm:$0xff]   ;;  %v440_v7 = vld [vmem:[#allocation6 + $0x30] sm:$0xff]   ;;  %v441_v8 = vld [vmem:[#allocation6 + $0x38] sm:$0xff]   ;;  %s335_s9 = sshll.u32 %s557_s8, 4  ;;  %s336_s9 = int_to_ptr.vmem [resolvable:$true] %s335_s9 }
  0x3a   :  { %385 = vmatpush3.bf16.msra.mxu0 %v434_v1  ;;  %v69_v9 = vld [vmem:[#allocation3] sm:$0xff]  ;;  %v70_v10 = vld [vmem:[#allocation3 + $0x8] sm:$0xff]  ;;  %v442_v12 = vld [vmem:[#allocation8] sm:$0xff]   ;;  %s520_s10 = scalar_lea.vmem %s336_s9, 256  ;;  %p525_p11 = scmp.lt.s32.totalorder %s336_s9, %s336_s9 }
  0x3b   :  { %386 = vmatprep.subr.bf16.mxu0 %v555_v0  ;;  %v71_v11 = vpack.c.bf16 %v70_v10, %v69_v9  ;;  %405 = vmatpush3.bf16.msra.mxu1 %v442_v12  ;;  %v443_v13 = vld [vmem:[#allocation8 + $0x8] sm:$0xff]   ;;  %v444_v14 = vld [vmem:[#allocation8 + $0x10] sm:$0xff]   ;;  %v445_v15 = vld [vmem:[#allocation8 + $0x18] sm:$0xff]   ;;  %p521_p10 = scmp.ne.s32.totalorder %s336_s9, %s520_s10  ;;  %p526_p12 = scmp.lt.s32.totalorder %s520_s10, %s520_s10 }
  0x3c   :  { %406 = vmatprep.subr.bf16.mxu1 %v555_v0  ;;  %v446_v16 = vld [vmem:[#allocation8 + $0x20] sm:$0xff]   ;;  %v447_v17 = vld [vmem:[#allocation8 + $0x28] sm:$0xff]   ;;  %v448_v18 = vld [vmem:[#allocation8 + $0x30] sm:$0xff]  }
  0x3d   :  { %v449_v19 = vld [vmem:[#allocation8 + $0x38] sm:$0xff]   ;;  %v348_v20 = vld [vmem:[%s656_s2] ss:$0 sm:$0xff]  ;;  %p527_p13 = por %p526_p12, %p525_p11 }
  0x3e   :  { %387 = vmatpush3.bf16.msra.mxu0 %v435_v2  ;;  %v365_v46 = vld [vmem:[%s658_s4] ss:$0 sm:$0xff] }
  0x3f   :  { %388 = vmatprep.subr.bf16.mxu0 %v555_v0  ;;  %407 = vmatpush3.bf16.msra.mxu1 %v443_v13  ;;  %p528_p0 = pnand %p527_p13, %p521_p10 }
  0x40   :  { %408 = vmatprep.subr.bf16.mxu1 %v555_v0 }
  0x42   :  { %389 = vmatpush3.bf16.msra.mxu0 %v436_v3 }
  0x43   :  { %390 = vmatprep.subr.bf16.mxu0 %v555_v0  ;;  %409 = vmatpush3.bf16.msra.mxu1 %v444_v14 }
  0x44   :  { %410 = vmatprep.subr.bf16.mxu1 %v555_v0 }
  0x46   :  { %391 = vmatpush3.bf16.msra.mxu0 %v437_v4 }
  0x47   :  { %392 = vmatprep.subr.bf16.mxu0 %v555_v0  ;;  %411 = vmatpush3.bf16.msra.mxu1 %v445_v15 }
  0x48   :  { %412 = vmatprep.subr.bf16.mxu1 %v555_v0 }
  0x4a   :  { %393 = vmatpush3.bf16.msra.mxu0 %v438_v5 }
  0x4b   :  { %394 = vmatprep.subr.bf16.mxu0 %v555_v0  ;;  %413 = vmatpush3.bf16.msra.mxu1 %v446_v16 }
  0x4c   :  { %414 = vmatprep.subr.bf16.mxu1 %v555_v0 }
  0x4e   :  { %395 = vmatpush3.bf16.msra.mxu0 %v439_v6 }
  0x4f   :  { %396 = vmatprep.subr.bf16.mxu0 %v555_v0  ;;  %415 = vmatpush3.bf16.msra.mxu1 %v447_v17 }
  0x50   :  { %416 = vmatprep.subr.bf16.mxu1 %v555_v0 }
  0x52   :  { %397 = vmatpush3.bf16.msra.mxu0 %v440_v7 }
  0x53   :  { %398 = vmatprep.subr.bf16.mxu0 %v555_v0  ;;  %417 = vmatpush3.bf16.msra.mxu1 %v448_v18 }
  0x54   :  { %418 = vmatprep.subr.bf16.mxu1 %v555_v0 }
  0x56   :  { %399 = vmatpush3.bf16.msra.mxu0 %v441_v8 }
  0x57   :  { %419 = vmatpush3.bf16.msra.mxu1 %v449_v19 }
  0x59   :  { %401 = vmatmul.mubr.bf16.vlgmr.msra.gmra.mrb[0].mxu0 %v71_v11 }
 0x12c   :  { %v177_v21 = vpop.f32.mrb[0].mxu0 }
 0x12d   :  { %v178_v22 = vadd.f32 %v348_v20, %v177_v21  ;;  %v402_v23 = vpop.f32.mrb[1].mxu0 }
 0x12e   :  { %v180_v24 = vpop.f32.mrb[2].mxu0 }
 0x12f   :  { %v184_v25 = vmul.f32 %v178_v22, %v178_v22  ;;  %v181_v26 = vadd.f32 %v348_v20, %v180_v24  ;;  %v403_v27 = vpop.f32.mrb[3].mxu0 }
 0x131   :  { %v186_v28 = vmul.f32 %v184_v25, %v178_v22  ;;  %v185_v29 = vmul.f32 %v181_v26, %v181_v26 }
 0x133   :  { %v188_v30 = vmul.f32 0.044715, %v186_v28  ;;  %v187_v31 = vmul.f32 %v185_v29, %v181_v26 }
 0x135   :  { %v190_v32 = vadd.f32 %v188_v30, %v178_v22  ;;  %v189_v33 = vmul.f32 0.044715, %v187_v31 }
 0x137   :  { %v192_v34 = vmul.f32 0.7978846, %v190_v32  ;;  %v191_v35 = vadd.f32 %v189_v33, %v181_v26 }
 0x139   :  { %450 = vtanh.f32 %v192_v34  ;;  %v193_v36 = vmul.f32 0.7978846, %v191_v35 }
 0x13b   :  { %452 = vtanh.f32 %v193_v36 }
 0x143   :  { %v451_v37 = vpop.eup %450 }
 0x144   :  { %v196_v38 = vadd.f32 1.0, %v451_v37 }
 0x145   :  { %v453_v39 = vpop.eup %452 }
 0x146   :  { %v197_v40 = vadd.f32 1.0, %v453_v39  ;;  %v198_v41 = vmul.f32 0.5, %v196_v38 }
 0x148   :  { %v199_v42 = vmul.f32 0.5, %v197_v40  ;;  %v200_v43 = vmul.f32 %v198_v41, %v178_v22 }
 0x14a   :  { %v201_v44 = vmul.f32 %v199_v42, %v181_v26 }
 0x14c   :  { %v204_v45 = vpack.c.bf16 %v201_v44, %v200_v43 }
 0x14e   :  { %421 = vmatmul.mubr.bf16.vlgmr.msra.gmra.mrb[0].mxu1 %v204_v45 }
 0x221   :  { %v303_v47 = vpop.f32.mrb[0].mxu1 }
 0x222   :  { %v326_v48 = vadd.f32 %v365_v46, %v303_v47  ;;  %v422_v49 = vpop.f32.mrb[1].mxu1 }
 0x223   :  { %v306_v50 = vpop.f32.mrb[2].mxu1 }
 0x224   :  { %328 = vst [vmem:[#allocation9] sm:$0xff] %v326_v48  ;;  %v327_v51 = vadd.f32 %v365_v46, %v306_v50  ;;  %v423_v52 = vpop.f32.mrb[3].mxu1 }
 0x226   :  { %329 = vst [vmem:[#allocation9 + $0x8] sm:$0xff] %v327_v51 }
 0x227   :  { %531 = shalt.err (!%p528_p0)
}
 0x228   :  { %s532_s12 = scalar_lea.hbm %s659_s5, 256 }
 0x229   :  { %p533_p1 = scmp.ne.s32.totalorder %s659_s5, %s532_s12  ;;  %p536_p2 = scmp.lt.u32.totalorder %s532_s12, %s659_s5 }
 0x22b   :  { %p538_p3 = pnand %p536_p2, %p533_p1 }
 0x22d   :  { %541 = shalt.err (!%p538_p3)
}
 0x22e   :  { %341 = dma.vmem_to_hbm [thread:$0]  %s336_s9, 256, %s659_s5, [#allocation5], %s552_s1, %s552_s1, %s553_s17  }
 0x22f   :  { %546 = dma.done.wait [#allocation5], 256  }
 0x230   :  { %547 = vsyncadd [#allocation5], 4294967040 }
 0x231   :  { %345 = vsyncpa [#allocation4], 1 }
 0x232   :  { %346 = vsyncpa [#allocation7], 1 }
 0x233   :  { %347 = vsyncpa [#allocation5], 1 }

</bundles_post_ra>
